<compile_context>
chip_gen: v5e
topology: v5e:2x2
jax: 0.10.0
libtpu: 0.0.40
codegen_flags: <defaults>
</compile_context>

<pallas_src>
import math
from functools import partial

import jax
import jax.numpy as jnp
from jax import lax
from jax.experimental import pallas as pl
from jax.experimental.pallas import tpu as pltpu

_LOG_2PI = math.log(2.0 * math.pi)


def _round_up(x, m):
    return ((x + m - 1) // m) * m


# ---------------------------------------------------------------------------
# Kernel (one batch tile, feature-major: features on sublanes, batch on lanes)
# ---------------------------------------------------------------------------
def _actor_critic_kernel(x_ref, a_ref, w1_ref, w2_ref, w3_ref, iv_ref, out_ref,
                         *, action_dim):
    # x_ref  : (S+1, TB) f32   state tile + trailing ones row (layer-1 bias column)
    # a_ref  : (OR,  TB) f32   action tile zero-padded to OR rows
    # w1_ref : (HP, S+1) bf16  fused actor|critic layer-1 weights, bias in column S
    # w2_ref : (HP,  HP) bf16  block-diagonal layer-2 weights, bias in column HP-1
    # w3_ref : (OR,  HP) bf16  actor/critic heads, bias in column HP-1
    # iv_ref : (OR,   1) f32   1/action_var in rows [0, A), zeros elsewhere
    # out_ref: (OR,  TB) f32   rows = [mean (A), value (1), -0.5*maha (1), pad...]
    f32 = jnp.float32
    bf16 = jnp.bfloat16
    tb = x_ref.shape[1]
    hp = w1_ref.shape[0]
    ones_row = hp - 1                       # hidden "ones" channel (carries biases)

    x = x_ref[...].astype(bf16)             # (S+1, TB), batch on lanes

    hid_row = lax.broadcasted_iota(jnp.int32, (hp, tb), 0)
    keep_one = hid_row == ones_row          # computed once, reused for both layers

    # fused layer 1: rows [0,W) actor, [W,2W) critic; bias rides the MXU via x's ones row
    y1 = jnp.dot(w1_ref[...], x, preferred_element_type=f32)          # (HP, TB)
    y1 = jnp.where(keep_one, 1.0, jnp.tanh(y1))                       # ones channel -> 1

    # fused layer 2 (block-diagonal actor/critic); bias in column HP-1
    y2 = jnp.dot(w2_ref[...], y1.astype(bf16), preferred_element_type=f32)
    y2 = jnp.where(keep_one, 1.0, jnp.tanh(y2))

    # fused layer 3: rows [0,A) actor mean pre-tanh, row A critic value
    z3 = jnp.dot(w3_ref[...], y2.astype(bf16), preferred_element_type=f32)  # (OR, TB)
    t3 = jnp.tanh(z3)                                                  # rows >= A unused

    # diagonal-Gaussian Mahalanobis term; rows >= A are masked out by iv == 0
    diff = a_ref[...] - t3                                             # (OR, TB)
    neg_half_maha = -0.5 * jnp.sum(diff * diff * iv_ref[...], axis=0, keepdims=True)

    # assemble the full (OR, TB) slab with selects -> one unmasked full-tile store
    out_row = lax.broadcasted_iota(jnp.int32, z3.shape, 0)
    out_ref[...] = jnp.where(out_row < action_dim, t3,
                             jnp.where(out_row == action_dim, z3, neg_half_maha))


# ---------------------------------------------------------------------------
# Parameter packing (done once, outside the hot path) -- weights only
# ---------------------------------------------------------------------------
def pack_params(params):
    """Pack the six Linear layers into three bf16 matrices with biases folded in.

    params: (aw1, ab1, aw2, ab2, aw3, ab3, cw1, cb1, cw2, cb2, cw3, cb3) with weights
    stored (in_features, out_features) and biases (1, out_features).
    """
    (aw1, ab1, aw2, ab2, aw3, ab3,
     cw1, cb1, cw2, cb2, cw3, cb3) = params
    S, W = aw1.shape
    A = aw3.shape[1]
    H = 2 * W
    HP = _round_up(H + 1, 8)        # hidden rows + ones channel (row HP-1), 8-aligned
    OR = _round_up(A + 2, 8)        # output rows: mean(A) + value(1) + maha(1), 8-aligned
    ONE = HP - 1
    f32 = jnp.float32

    w1 = jnp.zeros((HP, S + 1), f32)
    w1 = w1.at[0:W, 0:S].set(aw1.T).at[W:H, 0:S].set(cw1.T)
    w1 = w1.at[0:W, S].set(ab1.reshape(-1)).at[W:H, S].set(cb1.reshape(-1))

    w2 = jnp.zeros((HP, HP), f32)
    w2 = w2.at[0:W, 0:W].set(aw2.T).at[W:H, W:H].set(cw2.T)
    w2 = w2.at[0:W, ONE].set(ab2.reshape(-1)).at[W:H, ONE].set(cb2.reshape(-1))

    w3 = jnp.zeros((OR, HP), f32)
    w3 = w3.at[0:A, 0:W].set(aw3.T).at[A, W:H].set(cw3.reshape(-1))
    w3 = w3.at[0:A, ONE].set(ab3.reshape(-1)).at[A, ONE].set(cb3[0, 0])

    bf16 = jnp.bfloat16
    return w1.astype(bf16), w2.astype(bf16), w3.astype(bf16)


# ---------------------------------------------------------------------------
# Wrapper (equivalent of ActorCritic.evaluate)
# ---------------------------------------------------------------------------
@jax.jit
def actor_critic_evaluate(state, action, action_var, w1, w2, w3):
    """Returns (action_logprobs (B,), state_values (B,1), dist_entropy (B,), action_mean (B,A))."""
    B, S = state.shape
    A = action.shape[-1]
    HP = w1.shape[0]
    OR = w3.shape[0]
    assert w1.shape[1] == S + 1 and w2.shape == (HP, HP) and w3.shape[1] == HP

    # --- batch tiling: few large lane-dense tiles ----------------------------
    TB_CAP = 2048
    b128 = _round_up(B, 128)
    if b128 <= 128:
        n_tiles, tb = 1, 128
    else:
        # >= 2 tiles keeps both TensorCores busy on dual-TC chips (v7x); on
        # single-TC v5e/v6e the one extra ~0.35us grid step is negligible.
        n_tiles = max(2, -(-b128 // TB_CAP))
        tb = _round_up(-(-b128 // n_tiles), 128)
    b_pad = n_tiles * tb

    # layout plumbing: batch on the lane axis, ones row for the layer-1 bias,
    # zero-pad the ragged batch tail.
    # TODO(synk): for very large B confirm XLA fuses this cast+transpose+pad with
    # the pallas_call; otherwise feed batch-major blocks and transpose in-kernel.
    f32 = jnp.float32
    x_aug = jnp.concatenate([state.T.astype(f32), jnp.ones((1, B), f32)], axis=0)
    x_aug = jnp.pad(x_aug, ((0, 0), (0, b_pad - B)))                     # (S+1, b_pad)
    a_pad = jnp.pad(action.T.astype(f32), ((0, OR - A), (0, b_pad - B)))  # (OR, b_pad)

    # single source of truth: inv_var / log-det / entropy all from action_var
    inv_var = jnp.zeros((OR, 1), f32).at[0:A, 0].set(1.0 / action_var)

    out_t = pl.pallas_call(
        partial(_actor_critic_kernel, action_dim=A),
        out_shape=jax.ShapeDtypeStruct((OR, b_pad), jnp.float32),
        grid=(n_tiles,),
        in_specs=[
            pl.BlockSpec((S + 1, tb), lambda i: (0, i)),   # state+ones (batch on lanes)
            pl.BlockSpec((OR, tb), lambda i: (0, i)),      # action (rows padded to OR)
            pl.BlockSpec(w1.shape, lambda i: (0, 0)),      # weights: resident, fetched once
            pl.BlockSpec(w2.shape, lambda i: (0, 0)),
            pl.BlockSpec(w3.shape, lambda i: (0, 0)),
            pl.BlockSpec(inv_var.shape, lambda i: (0, 0)),
        ],
        out_specs=pl.BlockSpec((OR, tb), lambda i: (0, i)),
        compiler_params=pltpu.CompilerParams(
            dimension_semantics=("parallel",)),
    )(x_aug, a_pad, w1, w2, w3, inv_var)

    # hoisted batch-independent diagonal-Gaussian constants
    log_det = jnp.sum(jnp.log(action_var))
    logp_shift = -0.5 * (A * _LOG_2PI + log_det)
    ent_const = 0.5 * A * (1.0 + _LOG_2PI) + 0.5 * log_det

    mean = out_t[:A, :B].T                       # (B, A)
    value = out_t[A, :B][:, None]                # (B, 1)
    logp = out_t[A + 1, :B] + logp_shift         # (B,)
    entropy = jnp.broadcast_to(ent_const, (B,)).astype(jnp.float32)
    return logp, value, entropy, mean


# ---------------------------------------------------------------------------
# Parameter init (PyTorch nn.Linear-style uniform ranges) and pure-JAX reference
# ---------------------------------------------------------------------------
def init_params(key, state_dim, action_dim, net_width):
    shapes = [
        (state_dim, net_width), (1, net_width),
        (net_width, net_width), (1, net_width),
        (net_width, action_dim), (1, action_dim),
        (state_dim, net_width), (1, net_width),
        (net_width, net_width), (1, net_width),
        (net_width, 1), (1, 1),
    ]
    fan_ins = [state_dim, state_dim, net_width, net_width, net_width, net_width,
               state_dim, state_dim, net_width, net_width, net_width, net_width]
    keys = jax.random.split(key, len(shapes))
    params = []
    for k, shp, fan_in in zip(keys, shapes, fan_ins):
        bound = 1.0 / math.sqrt(fan_in)
        params.append(jax.random.uniform(k, shp, jnp.float32, -bound, bound))
    return tuple(params)


def _reference_evaluate(state, action, action_var, params):
    """Pure-JAX reference with the same bf16-operand / f32-accumulate matmul numerics."""
    (aw1, ab1, aw2, ab2, aw3, ab3,
     cw1, cb1, cw2, cb2, cw3, cb3) = params
    bf = lambda t: t.astype(jnp.bfloat16)
    mm = lambda x, w: jnp.dot(bf(x), bf(w), preferred_element_type=jnp.float32)
    h = jnp.tanh(mm(state, aw1) + ab1)
    h = jnp.tanh(mm(h, aw2) + ab2)
    mean = jnp.tanh(mm(h, aw3) + ab3)
    c = jnp.tanh(mm(state, cw1) + cb1)
    c = jnp.tanh(mm(c, cw2) + cb2)
    value = mm(c, cw3) + cb3
    k = action.shape[-1]
    log_det = jnp.sum(jnp.log(action_var))
    diff = action - mean
    maha = jnp.sum(diff * diff / action_var[None, :], axis=-1)
    logp = -0.5 * (maha + k * _LOG_2PI + log_det)
    ent = jnp.full((state.shape[0],), 0.5 * k * (1.0 + _LOG_2PI) + 0.5 * log_det)
    return logp, value, ent, mean


if __name__ == "__main__":
    batch = 200            # not a multiple of 128 -> exercises padding; grid = 2 tiles
    state_dim = 8
    action_dim = 4
    net_width = 32
    action_std_init = 0.6

    key = jax.random.PRNGKey(0)
    k_params, k_state, k_action = jax.random.split(key, 3)

    params = init_params(k_params, state_dim, action_dim, net_width)
    action_var = jnp.full((action_dim,), action_std_init * action_std_init,
                          dtype=jnp.float32)
    w1, w2, w3 = pack_params(params)

    state = jax.random.normal(k_state, (batch, state_dim), jnp.float32)
    action = jax.random.normal(k_action, (batch, action_dim), jnp.float32)

    logp, value, ent, mean = actor_critic_evaluate(state, action, action_var,
                                                   w1, w2, w3)
    jax.block_until_ready((logp, value, ent, mean))

    r_logp, r_value, r_ent, r_mean = _reference_evaluate(state, action, action_var, params)
    assert jnp.allclose(mean, r_mean, atol=2e-2, rtol=2e-2), "mean mismatch"
    assert jnp.allclose(value, r_value, atol=2e-2, rtol=2e-2), "value mismatch"
    assert jnp.allclose(logp, r_logp, atol=3e-2, rtol=2e-2), "log_prob mismatch"
    assert jnp.allclose(ent, r_ent, atol=2e-2, rtol=2e-2), "entropy mismatch"

    # TODO(synk): act()'s MultivariateNormal.sample() RNG draw stays on the JAX/host side;
    # the kernel supplies action_mean and state_value needed for it.
    print("KERNEL_OK")
</pallas_src>

<mosaic_0001>
module attributes {stable_mosaic.version = 11 : i64} {
  func.func @_actor_critic_kernel(%arg0: i32, %arg1: memref<9x128xf32, #tpu.memory_space<vmem>>, %arg2: memref<8x128xf32, #tpu.memory_space<vmem>>, %arg3: memref<72x9xbf16, #tpu.memory_space<vmem>>, %arg4: memref<72x72xbf16, #tpu.memory_space<vmem>>, %arg5: memref<8x72xbf16, #tpu.memory_space<vmem>>, %arg6: memref<8x1xf32, #tpu.memory_space<vmem>>, %arg7: memref<8x128xf32, #tpu.memory_space<vmem>>) attributes {dimension_semantics = [#tpu.dimension_semantics<parallel>], iteration_bounds = array<i64: 2>, scalar_prefetch = 0 : i64, scratch_operands = 0 : i64, tpu.core_type = #tpu.core_type<tc>, window_params = [{transform_indices = @transform_0, window_bounds = array<i64: 9, 128>}, {transform_indices = @transform_1, window_bounds = array<i64: 8, 128>}, {pipeline_mode = #tpu.pipeline_mode<synchronous>, transform_indices = @transform_2, window_bounds = array<i64: 72, 9>}, {pipeline_mode = #tpu.pipeline_mode<synchronous>, transform_indices = @transform_3, window_bounds = array<i64: 72, 72>}, {pipeline_mode = #tpu.pipeline_mode<synchronous>, transform_indices = @transform_4, window_bounds = array<i64: 8, 72>}, {pipeline_mode = #tpu.pipeline_mode<synchronous>, transform_indices = @transform_5, window_bounds = array<i64: 8, 1>}, {transform_indices = @transform_6, window_bounds = array<i64: 8, 128>}]} {
    %c0 = arith.constant 0 : index
    %c0_0 = arith.constant 0 : index
    %0 = vector.load %arg1[%c0, %c0_0] : memref<9x128xf32, #tpu.memory_space<vmem>>, vector<9x128xf32>
    %1 = arith.truncf %0 : vector<9x128xf32> to vector<9x128xbf16>
    %2 = tpu.iota {dimensions = array<i32: 0>} : vector<72x128xi32>
    %c71_i32 = arith.constant 71 : i32
    %3 = vector.broadcast %c71_i32 : i32 to vector<72x128xi32>
    %4 = arith.cmpi eq, %2, %3 : vector<72x128xi32>
    %c0_1 = arith.constant 0 : index
    %c0_2 = arith.constant 0 : index
    %5 = vector.load %arg3[%c0_1, %c0_2] : memref<72x9xbf16, #tpu.memory_space<vmem>>, vector<72x9xbf16>
    %cst = arith.constant dense<0.000000e+00> : vector<72x128xf32>
    %6 = tpu.matmul %5, %1, %cst {dimension_numbers = #tpu.dot_dimension_numbers<[1], [0], [0], [1], [0, 0, 1, 1], [], []>} : vector<72x9xbf16>, vector<9x128xbf16>, vector<72x128xf32> -> vector<72x128xf32>
    %7 = math.tanh %6 : vector<72x128xf32>
    %cst_3 = arith.constant 1.000000e+00 : f32
    %8 = vector.broadcast %cst_3 : f32 to vector<72x128xf32>
    %9 = arith.select %4, %8, %7 : vector<72x128xi1>, vector<72x128xf32>
    %c0_4 = arith.constant 0 : index
    %c0_5 = arith.constant 0 : index
    %10 = vector.load %arg4[%c0_4, %c0_5] : memref<72x72xbf16, #tpu.memory_space<vmem>>, vector<72x72xbf16>
    %11 = arith.truncf %9 : vector<72x128xf32> to vector<72x128xbf16>
    %cst_6 = arith.constant dense<0.000000e+00> : vector<72x128xf32>
    %12 = tpu.matmul %10, %11, %cst_6 {dimension_numbers = #tpu.dot_dimension_numbers<[1], [0], [0], [1], [0, 0, 1, 1], [], []>} : vector<72x72xbf16>, vector<72x128xbf16>, vector<72x128xf32> -> vector<72x128xf32>
    %13 = math.tanh %12 : vector<72x128xf32>
    %cst_7 = arith.constant 1.000000e+00 : f32
    %14 = vector.broadcast %cst_7 : f32 to vector<72x128xf32>
    %15 = arith.select %4, %14, %13 : vector<72x128xi1>, vector<72x128xf32>
    %c0_8 = arith.constant 0 : index
    %c0_9 = arith.constant 0 : index
    %16 = vector.load %arg5[%c0_8, %c0_9] : memref<8x72xbf16, #tpu.memory_space<vmem>>, vector<8x72xbf16>
    %17 = arith.truncf %15 : vector<72x128xf32> to vector<72x128xbf16>
    %cst_10 = arith.constant dense<0.000000e+00> : vector<8x128xf32>
    %18 = tpu.matmul %16, %17, %cst_10 {dimension_numbers = #tpu.dot_dimension_numbers<[1], [0], [0], [1], [0, 0, 1, 1], [], []>} : vector<8x72xbf16>, vector<72x128xbf16>, vector<8x128xf32> -> vector<8x128xf32>
    %19 = math.tanh %18 : vector<8x128xf32>
    %c0_11 = arith.constant 0 : index
    %c0_12 = arith.constant 0 : index
    %20 = vector.load %arg2[%c0_11, %c0_12] : memref<8x128xf32, #tpu.memory_space<vmem>>, vector<8x128xf32>
    %21 = arith.subf %20, %19 : vector<8x128xf32>
    %22 = arith.mulf %21, %21 : vector<8x128xf32>
    %c0_13 = arith.constant 0 : index
    %c0_14 = arith.constant 0 : index
    %23 = vector.load %arg6[%c0_13, %c0_14] : memref<8x1xf32, #tpu.memory_space<vmem>>, vector<8x1xf32>
    %24 = vector.broadcast %23 : vector<8x1xf32> to vector<8x128xf32>
    %25 = arith.mulf %22, %24 : vector<8x128xf32>
    %cst_15 = arith.constant dense<0.000000e+00> : vector<128xf32>
    %26 = vector.multi_reduction <add>, %25, %cst_15 [0] : vector<8x128xf32> to vector<128xf32>
    %27 = vector.shape_cast %26 : vector<128xf32> to vector<1x128xf32>
    %cst_16 = arith.constant -5.000000e-01 : f32
    %28 = vector.broadcast %cst_16 : f32 to vector<1x128xf32>
    %29 = arith.mulf %28, %27 : vector<1x128xf32>
    %30 = tpu.iota {dimensions = array<i32: 0>} : vector<8x128xi32>
    %c4_i32 = arith.constant 4 : i32
    %31 = vector.broadcast %c4_i32 : i32 to vector<8x128xi32>
    %32 = arith.cmpi slt, %30, %31 : vector<8x128xi32>
    %c4_i32_17 = arith.constant 4 : i32
    %33 = vector.broadcast %c4_i32_17 : i32 to vector<8x128xi32>
    %34 = arith.cmpi eq, %30, %33 : vector<8x128xi32>
    %35 = vector.shape_cast %29 : vector<1x128xf32> to vector<1x128xf32>
    %36 = vector.broadcast %35 : vector<1x128xf32> to vector<8x128xf32>
    %37 = arith.select %34, %18, %36 : vector<8x128xi1>, vector<8x128xf32>
    %38 = arith.select %32, %19, %37 : vector<8x128xi1>, vector<8x128xf32>
    %c0_18 = arith.constant 0 : index
    %c0_19 = arith.constant 0 : index
    %39 = vector.load %arg7[%c0_18, %c0_19] : memref<8x128xf32, #tpu.memory_space<vmem>>, vector<8x128xf32>
    tpu.vector_store %arg7[%c0_18, %c0_19], %38 {strides = array<i32>} : memref<8x128xf32, #tpu.memory_space<vmem>>, vector<8x128xf32>,
    return
  }
  func.func @transform_0(%arg0: i32) -> (i32, i32) {
    %c0_i32 = arith.constant 0 : i32
    %c0_i32_0 = arith.constant 0 : i32
    return %c0_i32, %arg0 : i32, i32
  }
  func.func @transform_1(%arg0: i32) -> (i32, i32) {
    %c0_i32 = arith.constant 0 : i32
    %c0_i32_0 = arith.constant 0 : i32
    return %c0_i32, %arg0 : i32, i32
  }
  func.func @transform_2(%arg0: i32) -> (i32, i32) {
    %c0_i32 = arith.constant 0 : i32
    %c0_i32_0 = arith.constant 0 : i32
    %c0_i32_1 = arith.constant 0 : i32
    return %c0_i32, %c0_i32_0 : i32, i32
  }
  func.func @transform_3(%arg0: i32) -> (i32, i32) {
    %c0_i32 = arith.constant 0 : i32
    %c0_i32_0 = arith.constant 0 : i32
    %c0_i32_1 = arith.constant 0 : i32
    return %c0_i32, %c0_i32_0 : i32, i32
  }
  func.func @transform_4(%arg0: i32) -> (i32, i32) {
    %c0_i32 = arith.constant 0 : i32
    %c0_i32_0 = arith.constant 0 : i32
    %c0_i32_1 = arith.constant 0 : i32
    return %c0_i32, %c0_i32_0 : i32, i32
  }
  func.func @transform_5(%arg0: i32) -> (i32, i32) {
    %c0_i32 = arith.constant 0 : i32
    %c0_i32_0 = arith.constant 0 : i32
    %c0_i32_1 = arith.constant 0 : i32
    return %c0_i32, %c0_i32_0 : i32, i32
  }
  func.func @transform_6(%arg0: i32) -> (i32, i32) {
    %c0_i32 = arith.constant 0 : i32
    %c0_i32_0 = arith.constant 0 : i32
    return %c0_i32, %arg0 : i32, i32
  }
}

</mosaic_0001>

<bundles_post_ra>
// kernel: actor_critic_evaluate.1
= control target key start
LH: loop header
LB: loop body
LE: loop exit
PB: predicated region body
PF: predicated region fallthrough
CT: control target
= control target key end

     0   :  { %s856_s21 = smov 0   ;;  %s858_s22 = smov 0   ;;  %s970_s0 = inlined_call_operand.vmem [shape: f32[9,256], index: 0, kind: input, shape index: {}]   ;;  %s971_s1 = inlined_call_operand.vmem [shape: f32[8,256], index: 1, kind: input, shape index: {}]   ;;  %s972_s2 = inlined_call_operand.vmem [shape: bf16[72,9], index: 2, kind: input, shape index: {}]   ;;  %s973_s3 = inlined_call_operand.vmem [shape: bf16[72,72], index: 3, kind: input, shape index: {}]   ;;  %s974_s4 = inlined_call_operand.vmem [shape: bf16[8,72], index: 4, kind: input, shape index: {}]   ;;  %s975_s5 = inlined_call_operand.vmem [shape: f32[8,1], index: 5, kind: input, shape index: {}]   ;;  %s976_s6 = inlined_call_operand.vmem [shape: f32[8,256], index: 6, kind: output, shape index: {}]  }
   0x1   :  { %s860_s23 = smov 0  }
   0x2 LB: > { %s661_s24 = sadd.s32 4294967295, %s817_s23   ;;  %s873_s25 = sadd.s32 1, %s817_s23   ;;  %s817_s23 = sphi %s860_s23, %s979_s23   ;;  %s813_s22 = sphi %s858_s22, %s978_s22   ;;  %s809_s21 = sphi %s856_s21, %s977_s21  }
   0x3   : > { %s20_s26 = ssub.s32 %s817_s23, %s873_s25  ;;  %s23_s27 = sadd.s32 1, %s813_s22 }
   0x4   : > { %p21_p0 = scmp.eq.s32.totalorder %s20_s26, 0  ;;  %p30_p1 = scmp.ne.s32.totalorder %s813_s22, %s809_s21 }
   0x5   : > { %p31_p2 = scmp.eq.s32.totalorder %s817_s23, 0  ;;  %p664_p4 = scmp.ge.s32.totalorder %s817_s23, 2 }
   0x6   : > { %s882_s28 = scalar_select %p21_p0, %s813_s22, %s23_s27  }
   0x7   : > { %p32_p3 = por %p31_p2, %p30_p1  ;;  %204 = sbr.rel (%p664_p4) target bundleno = 18 (0x12), region = 32 }
   0xc   : > { %207 = sbr.rel (!%p32_p3) target bundleno = 18 (0x12), region = 36  ;;  %s209_s29 = sand.u32 (%p32_p3), 1, %s813_s22  }
   0xd   : > { %s666_s30 = sshll.u32 (%p32_p3), %s817_s23, 3  ;;  %s665_s7 = sshll.u32 (%p32_p3), %s209_s29, 4 }
   0xe   : > { %s213_s10 = scalar_lea.vmem (%p32_p3), %s970_s0, %s666_s30  ;;  %s211_s11 = scalar_lea.vmem (%p32_p3), [#allocation2], %s665_s7 }
   0xf   : > { %v244_v0 = vld [vmem:[%s213_s10] sm:$0xff] (%p32_p3)  ;;  %v246_v1 = vld [vmem:[%s213_s10 + $0x10] sm:$0xff] (%p32_p3) }
  0x10   : > { %245 = vst [vmem:[%s211_s11] sm:$0xff] (%p32_p3), %v244_v0 }
  0x11   : > { %247 = vst [vmem:[%s211_s11 + $0x8] sm:$0xff] %v246_v1 }
  0x12 PF: > { %p667_p5 = scmp.ge.s32.totalorder %s817_s23, 1  ;;  %p259_p6 = scmp.lt.s32.totalorder %s817_s23, 3 }
  0x14   : > { %p260_p7 = pnand %p667_p5, %p259_p6 }
  0x15   : > { %s266_s12 = sand.u32 (!%p260_p7), 1, %s809_s21   ;;  %p298_p8 = scmp.lt.s32.totalorder (!%p260_p7), %s661_s24, 1 }
  0x16   : > { %263 = sbr.rel (%p260_p7) target bundleno = 589 (0x24d), region = 78  ;;  %s668_s13 = sshll.u32 (!%p260_p7), %s266_s12, 4 }
  0x17   : > { %s268_s14 = scalar_lea.vmem (!%p260_p7), [#allocation2], %s668_s13 }
  0x1b   : > { %vm377_vm0 = vcmask 1043456   ;;  %vm378_vm1 = vcmask 1044480   ;;  %v819_v2 = vmov 65535   ;;  %v307_v4 = vld [vmem:[%s268_s14] sm:$0xff]  ;;  %v308_v5 = vld [vmem:[%s268_s14 + $0x8] sm:$0x1]  ;;  %v310_v21 = vlaneseq }
  0x1c   : > { %v379_v3 = vsel %vm377_vm0, 4294967295, %v819_v2  ;;  %v309_v7 = vpack.c.bf16 %v308_v5, %v307_v4  ;;  %v716_v9 = vld [vmem:[%s972_s2] sm:$0xff]  ;;  %vm361_vm2 = vcmask 72704   ;;  %v717_v13 = vld [vmem:[%s972_s2 + $0x8] sm:$0xff]  ;;  %v718_v14 = vld [vmem:[%s972_s2 + $0x10] sm:$0xff]  ;;  %vm472_vm4 = vcmask 588800  }
  0x1d   : > { %v380_v6 = vsel %vm378_vm1, %v379_v3, 0  ;;  %v337_v10 = vld [vmem:[%s972_s2 + $0x20] sm:$0xf]  ;;  %v719_v15 = vld [vmem:[%s972_s2 + $0x18] sm:$0xff]  ;;  %v909_v22 = vshrl.u32 %v310_v21, 7  ;;  %v721_v49 = vld [vmem:[%s973_s3 + $0x8] sm:$0xff] }
  0x1e   : > { %v382_v8 = vand.u32 %v380_v6, %v309_v7  ;;  %v355_v11 = vunpack.c.l.b16 %v337_v10  ;;  %v720_v45 = vld [vmem:[%s973_s3] sm:$0xff]  ;;  %v723_v46 = vld [vmem:[%s973_s3 + $0x18] sm:$0xff]  ;;  %v722_v51 = vld [vmem:[%s973_s3 + $0x10] sm:$0xff]  ;;  %v820_v63 = vmov 0   ;;  %s981_s24 = smov (!%p298_p8, %s661_s24), 1 }
  0x1f   : > { %v912_v24 = vadd.s32 64, %v909_v22  ;;  %v443_v47 = vld [vmem:[%s973_s3 + $0x20] sm:$0xf]  ;;  %756 = vset.pattern.permute.xlu0 %v820_v63  ;;  %s669_s20 = sshll.u32 %s981_s24, 3  ;;  %vm586_vm5 = vcmp.eq.s32.totalorder %v909_v22, 4  ;;  %vm585_vm6 = vcmp.lt.s32.totalorder %v909_v22, 4 }
  0x20   : > { %391 = vmatpush.bf16.msra.mxu0 %v382_v8  ;;  %724 = vmatpush.bf16.msra.mxu2 %v382_v8  ;;  %v360_v12 = vpack.c.b16 %v355_v11, %v355_v11  ;;  %v466_v48 = vunpack.c.l.b16 %v443_v47  ;;  %v571_v60 = vld [vmem:[%s975_s5] sm:$0xff]  ;;  %s301_s27 = scalar_lea.vmem %s971_s1, %s669_s20  ;;  %s305_s29 = scalar_lea.vmem %s976_s6, %s669_s20 }
  0x21   : > { %vm328_vm3 = vcmp.eq.s32.totalorder %v912_v24, 71  ;;  %574 = vperm.xlu0 %756, %v571_v60  }
  0x22   : > { %v471_v50 = vpack.c.b16 %v466_v48, %v466_v48 }
  0x23   : > { %687 = vmatmul.msk.bf16.vlgmr.msra.gmra.mxu0 %vm361_vm2, %v716_v9  ;;  %691 = vmatmul.msk.bf16.vlgmr.msra.gmra.mxu2 %vm361_vm2, %v360_v12 }
  0x33   : > { %688 = vmatmul.msk.bf16.gmra.mxu0 %vm361_vm2, %v717_v13 }
  0x43   : > { %689 = vmatmul.msk.bf16.gmra.mxu0 %vm361_vm2, %v718_v14 }
  0x53   : > { %690 = vmatmul.msk.bf16.gmra.mxu0 %vm361_vm2, %v719_v15 }
  0xa0   : > { %v393_v16 = vpop.f32.mrf.mxu0 }
  0xa6   : > { %v413_v18 = vpop.f32.mrf.mxu2 }
  0xa7   : > { %757 = vtanh.f32 %v413_v18  ;;  %v568_v18 = vld [vmem:[%s301_s27] sm:$0xff] }
  0xa8   : > { %v395_v17 = vpop.f32.mrf.mxu0 }
  0xad   : > { %v758_v23 = vpop.eup %757 }
  0xae   : > { %v415_v20 = vpop.f32.mrf.mxu2  ;;  %v434_v26 = vsel %vm328_vm3, 1.0, %v758_v23  ;;  %v575_v23 = vpop.permute.xlu0 %574 }
  0xaf   : > { %v448_v27 = vpack.c.bf16 %v434_v26, %v434_v26 }
  0xb0   : > { %v398_v19 = vpop.f32.mrf.mxu0 }
  0xb1   : > { %v489_v28 = vsel %vm377_vm0, %v448_v27, 0 }
  0xb2   : > { %494 = vmatpush.bf16.msra.mxu1 %v489_v28  ;;  %725 = vmatpush.bf16.msra.mxu3 %v489_v28 }
  0xb8   : > { %v400_v25 = vpop.f32.mrf.mxu0 }
  0xc0   : > { %v403_v29 = vpop.f32.mrf.mxu0 }
  0xc8   : > { %v405_v30 = vpop.f32.mrf.mxu0 }
  0xd0   : > { %v408_v31 = vpop.f32.mrf.mxu0 }
  0xd1   : > { %759 = vtanh.f32 %v408_v31 }
  0xd7   : > { %v760_v33 = vpop.eup %759 }
  0xd8   : > { %v410_v32 = vpop.f32.mrf.mxu0 }
  0xd9   : > { %761 = vtanh.f32 %v410_v32 }
  0xda   : > { %763 = vtanh.f32 %v405_v30 }
  0xdb   : > { %765 = vtanh.f32 %v403_v29 }
  0xdc   : > { %767 = vtanh.f32 %v400_v25 }
  0xdd   : > { %769 = vtanh.f32 %v398_v19 }
  0xde   : > { %771 = vtanh.f32 %v395_v17 }
  0xdf   : > { %v762_v34 = vpop.eup %761  ;;  %773 = vtanh.f32 %v393_v16  ;;  %v542_v16 = vld [vmem:[%s974_s4] sm:$0xf] }
  0xe0   : > { %v447_v35 = vpack.c.bf16 %v762_v34, %v760_v33  ;;  %v764_v36 = vpop.eup %763 }
  0xe1   : > { %v766_v37 = vpop.eup %765 }
  0xe2   : > { %495 = vmatpush.bf16.msra.mxu1 %v447_v35  ;;  %726 = vmatpush.bf16.msra.mxu3 %v447_v35  ;;  %v446_v38 = vpack.c.bf16 %v764_v36, %v766_v37  ;;  %v768_v39 = vpop.eup %767 }
  0xe3   : > { %v770_v40 = vpop.eup %769 }
  0xe4   : > { %v445_v41 = vpack.c.bf16 %v768_v39, %v770_v40  ;;  %v772_v42 = vpop.eup %771 }
  0xe5   : > { %v774_v43 = vpop.eup %773 }
  0xe6   : > { %496 = vmatpush.bf16.msra.mxu1 %v446_v38  ;;  %727 = vmatpush.bf16.msra.mxu3 %v446_v38  ;;  %v444_v44 = vpack.c.bf16 %v772_v42, %v774_v43 }
  0xea   : > { %497 = vmatpush.bf16.msra.mxu1 %v445_v41  ;;  %728 = vmatpush.bf16.msra.mxu3 %v445_v41 }
  0xee   : > { %498 = vmatpush.bf16.msra.mxu1 %v444_v44  ;;  %729 = vmatpush.bf16.msra.mxu3 %v444_v44 }
  0xf1   : > { %708 = vmatmul.msk.bf16.vlgmr.msra.gmra.mxu1 %vm472_vm4, %v720_v45  ;;  %711 = vmatmul.msk.bf16.vlgmr.msra.gmra.mxu3 %vm472_vm4, %v723_v46 }
 0x101   : > { %709 = vmatmul.msk.bf16.gmra.mxu1 %vm472_vm4, %v721_v49  ;;  %712 = vmatmul.msk.bf16.gmra.mxu3 %vm472_vm4, %v471_v50 }
 0x111   : > { %710 = vmatmul.msk.bf16.gmra.mxu1 %vm472_vm4, %v722_v51 }
 0x16e   : > { %v500_v52 = vpop.f32.mrf.mxu1 }
 0x174   : > { %v515_v53 = vpop.f32.mrf.mxu3 }
 0x176   : > { %v502_v54 = vpop.f32.mrf.mxu1 }
 0x17c   : > { %v517_v55 = vpop.f32.mrf.mxu3 }
 0x17e   : > { %v505_v56 = vpop.f32.mrf.mxu1 }
 0x184   : > { %v520_v57 = vpop.f32.mrf.mxu3 }
 0x185   : > { %775 = vtanh.f32 %v520_v57 }
 0x186   : > { %v507_v58 = vpop.f32.mrf.mxu1  ;;  %777 = vtanh.f32 %v515_v53 }
 0x187   : > { %779 = vtanh.f32 %v517_v55 }
 0x18b   : > { %v776_v59 = vpop.eup %775 }
 0x18c   : > { %v522_v61 = vpop.f32.mrf.mxu3  ;;  %v541_v62 = vsel %vm328_vm3, 1.0, %v776_v59  ;;  %v778_v1 = vpop.eup %777 }
 0x18d   : > { %v547_v0 = vpack.c.bf16 %v541_v62, %v541_v62  ;;  %v780_v3 = vpop.eup %779 }
 0x18e   : > { %v510_v2 = vpop.f32.mrf.mxu1  ;;  %v546_v5 = vpack.c.bf16 %v780_v3, %v778_v1 }
 0x18f   : > { %v552_v4 = vsel %vm377_vm0, %v547_v0, 0  ;;  %781 = vtanh.f32 %v510_v2 }
 0x190   : > { %557 = vmatpush.bf16.msrb.mxu2 %v552_v4 }
 0x194   : > { %558 = vmatpush.bf16.msrb.mxu2 %v546_v5 }
 0x195   : > { %v782_v7 = vpop.eup %781 }
 0x196   : > { %v512_v6 = vpop.f32.mrf.mxu1 }
 0x197   : > { %783 = vtanh.f32 %v512_v6 }
 0x198   : > { %785 = vtanh.f32 %v507_v58 }
 0x199   : > { %787 = vtanh.f32 %v505_v56 }
 0x19a   : > { %789 = vtanh.f32 %v502_v54 }
 0x19b   : > { %791 = vtanh.f32 %v500_v52 }
 0x19d   : > { %v784_v8 = vpop.eup %783 }
 0x19e   : > { %v545_v9 = vpack.c.bf16 %v784_v8, %v782_v7  ;;  %v786_v10 = vpop.eup %785 }
 0x19f   : > { %v788_v11 = vpop.eup %787 }
 0x1a0   : > { %559 = vmatpush.bf16.msrb.mxu2 %v545_v9  ;;  %v544_v12 = vpack.c.bf16 %v786_v10, %v788_v11  ;;  %v790_v13 = vpop.eup %789 }
 0x1a1   : > { %v792_v14 = vpop.eup %791 }
 0x1a2   : > { %v543_v15 = vpack.c.bf16 %v790_v13, %v792_v14 }
 0x1a4   : > { %560 = vmatpush.bf16.msrb.mxu2 %v544_v12 }
 0x1a8   : > { %561 = vmatpush.bf16.msrb.mxu2 %v543_v15 }
 0x1ab   : > { %713 = vmatmul.msk.bf16.vlgmr.msrb.gmra.mxu2 %vm472_vm4, %v542_v16 }
 0x22e   : > { %v563_v17 = vpop.f32.mrf.mxu2 }
 0x22f   : > { %793 = vtanh.f32 %v563_v17 }
 0x235   : > { %v794_v19 = vpop.eup %793 }
 0x236   : > { %v565_v20 = vpop.f32.mrf.mxu2  ;;  %v569_v21 = vsub.f32 %v568_v18, %v794_v19 }
 0x238   : > { %v570_v24 = vmul.f32 %v569_v21, %v569_v21 }
 0x23a   : > { %v577_v25 = vmul.f32 %v575_v23, %v570_v24 }
 0x23c   : > { %v578_v26 = vrot.slane %v577_v25, 4 }
 0x23e   : > { %v579_v27 = vadd.f32 %v578_v26, %v577_v25 }
 0x240   : > { %v580_v28 = vrot.slane %v579_v27, 2 }
 0x242   : > { %v581_v29 = vadd.f32 %v580_v28, %v579_v27 }
 0x244   : > { %v582_v30 = vrot.slane %v581_v29, 1 }
 0x246   : > { %v583_v31 = vadd.f32 %v582_v30, %v581_v29 }
 0x248   : > { %v584_v32 = vmul.f32 -0.5, %v583_v31 }
 0x24a   : > { %v587_v33 = vsel %vm586_vm5, %v563_v17, %v584_v32 }
 0x24b   : > { %v588_v34 = vsel %vm585_vm6, %v794_v19, %v587_v33 }
 0x24c   : > { %589 = vst [vmem:[%s305_s29] sm:$0xff] %v588_v34 }
 0x24d PF: > { %p13_p9 = scmp.ge.s32.totalorder %s873_s25, 4   ;;  %s977_s21 = smov %s813_s22 }
 0x24e   : > { %s978_s22 = smov %s882_s28  ;;  %s979_s23 = smov %s873_s25 }
 0x24f   :  { %15 = sbr.rel (!%p13_p9) target bundleno = 2 (0x2), region = 120 }

</bundles_post_ra>
